<compile_context>
chip_gen: v7x
topology: tpu7x:2x2x1
jax: 0.10.0
libtpu: 0.0.40
codegen_flags: <defaults>
</compile_context>

<pallas_src>
import functools

import jax
import jax.numpy as jnp
from jax.experimental import pallas as pl
from jax.experimental.pallas import tpu as pltpu


def _conv_lrelu_kernel(xb_ref, xh_ref, w_ref, b_ref, o_ref, *, negative_slope):
    """One (batch, row-tile) grid step.

    xb_ref: (1, Th, Wo+1, SSC)   body rows [t*Th, t*Th+Th) of the s2d input
    xh_ref: (1, 1,  Wo+1, SSC)   halo row   t*Th+Th
    w_ref : (SSC, 4*C)           folded weights, columns ordered (qh, qw, cout)
    b_ref : (1, Wo*C)            bias pre-tiled for the lane-dense epilogue (f32)
    o_ref : (1, 1, Th, Wo*C)     lane-dense output tile
    """
    _, Th, Wp1, SSC = xb_ref.shape
    Wo = Wp1 - 1
    C4 = w_ref.shape[1]
    C = C4 // 4
    C2 = 2 * C

    # One wide MXU call covering all Th body rows and all 4 (qh, qw) tap groups.
    xb = xb_ref[0].reshape(Th * Wp1, SSC)
    y = jnp.dot(xb, w_ref[...], preferred_element_type=jnp.float32)
    y = y.reshape(Th, Wp1, C4)                                  # (Th, Wo+1, 4C)

    # Halo row (s2d super-row t*Th + Th); only its qh=1 columns are used.
    yh = jnp.dot(xh_ref[0, 0], w_ref[...], preferred_element_type=jnp.float32)
    yh = yh.reshape(1, Wp1, C4)

    # qh=0 contributions align with output rows; qh=1 contributions of body row
    # r feed output row r-1, and the halo row feeds the last output row.
    yq0 = y[:, :, :C2]
    if Th > 1:
        yq1 = jnp.concatenate([y[1:, :, C2:], yh[:, :, C2:]], axis=0)
    else:
        yq1 = yh[:, :, C2:]
    z = yq0 + yq1                                               # (Th, Wo+1, 2C)

    # qw combination on the (small) matmul OUTPUT: qw=1 needs a -1 shift along W.
    acc = z[:, :Wo, :C] + z[:, 1:, C:]                          # (Th, Wo, C) f32

    # Lane-dense f32 epilogue (bias + LeakyReLU) + single cast on store.
    acc = acc.reshape(Th, Wo * C) + b_ref[0]
    out = jnp.where(acc >= 0, acc, negative_slope * acc)
    o_ref[0, 0] = out.astype(o_ref.dtype)


def times_downing(x_nchw, weight, bias, *, times=2, negative_slope=0.01,
                  compute_dtype=jnp.bfloat16):
    """Forward pass of TimesDowning.

    x_nchw: (N, C, H, W)
    weight: (C_out, C_in, K, K)  (PyTorch Conv2d layout)
    bias:   (C_out,)
    """
    if times == 2:
        K, S, P = 3, 2, 1
    elif times == 4:
        K, S, P = 5, 4, 2
    else:
        raise ValueError("Times must be 2 or 4")

    N, C, H, W = x_nchw.shape
    Ho = (H + 2 * P - K) // S + 1
    Wo = (W + 2 * P - K) // S + 1
    SSC = S * S * C
    # Pad so every (qh, qw) in {0,1}^2 offset of the S-aligned kernel is
    # in-bounds (extra rows/cols beyond standard padding are only hit by
    # zero-weighted phantom taps). Holds because K == S + 1 for both modes.
    Hp, Wp = S * (Ho + 1), S * (Wo + 1)

    # ---- wrapper-side layout plumbing (cheap XLA pads / reshapes) -----------
    x_nhwc = jnp.transpose(x_nchw, (0, 2, 3, 1))
    x_pad = jnp.pad(x_nhwc, ((0, 0), (P, Hp - H - P), (P, Wp - W - P), (0, 0)))
    # space-to-depth: stride phases moved onto the channel (lane) axis.
    x_s2d = x_pad.reshape(N, Ho + 1, S, Wo + 1, S, C)
    x_s2d = jnp.transpose(x_s2d, (0, 1, 3, 2, 4, 5)).reshape(N, Ho + 1, Wo + 1, SSC)
    x_s2d = x_s2d.astype(compute_dtype)

    # Fold the KxK kernel into a zero-padded 2Sx2S kernel and pack ALL four
    # (qh, qw) S-aligned tap blocks into one (SSC, 4C) matmul operand. Channel
    # order e = (rh*S + rw)*C + cin matches the s2d layout; column order is
    # (qh, qw, cout).
    Kp = 2 * S
    w_pad = jnp.zeros((C, C, Kp, Kp), weight.dtype).at[:, :, :K, :K].set(weight)
    w_all = w_pad.reshape(C, C, 2, S, 2, S)            # (co, ci, qh, rh, qw, rw)
    w_all = jnp.transpose(w_all, (3, 5, 1, 2, 4, 0))   # (rh, rw, ci, qh, qw, co)
    w_all = w_all.reshape(SSC, 4 * C).astype(compute_dtype)
    # Bias pre-tiled for the lane-dense (Th, Wo*C) epilogue; stays f32.
    b_tiled = jnp.tile(bias.astype(jnp.float32), (Wo,)).reshape(1, Wo * C)

    # ---- row-tile selection --------------------------------------------------
    # Largest divisor of Ho (so the halo index stays in-bounds) whose body block
    # fits a ~6 MiB budget (x2 double-buffering; sized for v7x's 64 MiB VMEM,
    # comfortable on v5e/v6e), preferring >= 4 total parallel grid steps so both
    # v7x TensorCores / megacore halves stay busy.
    itembytes = jnp.dtype(compute_dtype).itemsize
    budget = 6 * 1024 * 1024
    divs = [d for d in range(1, Ho + 1) if Ho % d == 0]
    fits = [d for d in divs if d * (Wo + 1) * SSC * itembytes <= budget] or [1]
    cand = [d for d in fits if N * (Ho // d) >= 4]
    Th = max(cand) if cand else max(fits)
    T = Ho // Th

    kernel = functools.partial(_conv_lrelu_kernel, negative_slope=negative_slope)

    out_item = jnp.dtype(x_nchw.dtype).itemsize
    flops = 2 * N * Ho * Wo * K * K * C * C
    bytes_accessed = (x_s2d.size * itembytes + w_all.size * itembytes
                      + b_tiled.size * 4 + N * Ho * Wo * C * out_item)

    out = pl.pallas_call(
        kernel,
        out_shape=jax.ShapeDtypeStruct((N, T, Th, Wo * C), x_nchw.dtype),
        grid=(N, T),
        in_specs=[
            # body rows of the current tile
            pl.BlockSpec((1, Th, Wo + 1, SSC), lambda n, t: (n, t, 0, 0)),
            # one halo row (block size 1 along H -> block index == element index)
            pl.BlockSpec((1, 1, Wo + 1, SSC),
                         lambda n, t: (n, t * Th + Th, 0, 0)),
            # folded weights / pre-tiled bias stay resident across the grid
            pl.BlockSpec((SSC, 4 * C), lambda n, t: (0, 0)),
            pl.BlockSpec((1, Wo * C), lambda n, t: (0, 0)),
        ],
        out_specs=pl.BlockSpec((1, 1, Th, Wo * C), lambda n, t: (n, t, 0, 0)),
        compiler_params=pltpu.CompilerParams(
            dimension_semantics=("parallel", "parallel"),
            vmem_limit_bytes=48 * 1024 * 1024),
        cost_estimate=pl.CostEstimate(flops=flops, transcendentals=0,
                                      bytes_accessed=bytes_accessed),
    )(x_s2d, x_s2d, w_all, b_tiled)

    # (N, T, Th, Wo*C) -> NHWC -> NCHW
    out = out.reshape(N, Ho, Wo, C)
    return jnp.transpose(out, (0, 3, 1, 2))


def _reference(x_nchw, weight, bias, *, times=2, negative_slope=0.01):
    if times == 2:
        K, S, P = 3, 2, 1
    else:
        K, S, P = 5, 4, 2
    y = jax.lax.conv_general_dilated(
        x_nchw, weight,
        window_strides=(S, S),
        padding=((P, P), (P, P)),
        dimension_numbers=("NCHW", "OIHW", "NCHW"),
    ) + bias.reshape(1, -1, 1, 1)
    return jnp.where(y >= 0, y, negative_slope * y)


if __name__ == "__main__":
    key = jax.random.PRNGKey(0)
    N, C, H, W = 2, 4, 16, 16

    for Times in (2, 4):   # MST11 uses Times=2; Times=4 exercises the K=5 path
        K = 3 if Times == 2 else 5
        kx, kw_, kb = jax.random.split(jax.random.fold_in(key, Times), 3)
        x = jax.random.normal(kx, (N, C, H, W), dtype=jnp.float32)
        # Deterministic init mimicking PyTorch Conv2d default.
        fan_in = C * K * K
        bound = 1.0 / (fan_in ** 0.5)
        weight = jax.random.uniform(kw_, (C, C, K, K), minval=-bound,
                                    maxval=bound, dtype=jnp.float32)
        bias = jax.random.uniform(kb, (C,), minval=-bound, maxval=bound,
                                  dtype=jnp.float32)

        ref = _reference(x, weight, bias, times=Times)

        # Exact path (f32 operands) — tight tolerance.
        out32 = jax.block_until_ready(
            times_downing(x, weight, bias, times=Times,
                          compute_dtype=jnp.float32))
        assert out32.shape == ref.shape, (out32.shape, ref.shape)
        assert jnp.allclose(out32, ref, atol=1e-5, rtol=1e-5), float(
            jnp.max(jnp.abs(out32 - ref)))

        # Default bandwidth-optimized path (bf16 operands, f32 accumulation).
        out16 = jax.block_until_ready(
            times_downing(x, weight, bias, times=Times))
        assert out16.shape == ref.shape, (out16.shape, ref.shape)
        assert jnp.allclose(out16, ref, atol=3e-2, rtol=3e-2), float(
            jnp.max(jnp.abs(out16 - ref)))

    print("KERNEL_OK")
</pallas_src>

<mosaic_0001>
module attributes {stable_mosaic.version = 11 : i64} {
  func.func @_conv_lrelu_kernel(%arg0: i32, %arg1: i32, %arg2: memref<1x4x9x16xf32, #tpu.memory_space<vmem>>, %arg3: memref<1x1x9x16xf32, #tpu.memory_space<vmem>>, %arg4: memref<16x16xf32, #tpu.memory_space<vmem>>, %arg5: memref<1x32xf32, #tpu.memory_space<vmem>>, %arg6: memref<1x1x4x32xf32, #tpu.memory_space<vmem>>) attributes {dimension_semantics = [#tpu.dimension_semantics<parallel>, #tpu.dimension_semantics<parallel>], iteration_bounds = array<i64: 2, 2>, scalar_prefetch = 0 : i64, scratch_operands = 0 : i64, tpu.core_type = #tpu.core_type<tc>, window_params = [{transform_indices = @transform_0, window_bounds = array<i64: 1, 4, 9, 16>}, {transform_indices = @transform_1, window_bounds = array<i64: 1, 1, 9, 16>}, {pipeline_mode = #tpu.pipeline_mode<synchronous>, transform_indices = @transform_2, window_bounds = array<i64: 16, 16>}, {pipeline_mode = #tpu.pipeline_mode<synchronous>, transform_indices = @transform_3, window_bounds = array<i64: 1, 32>}, {transform_indices = @transform_4, window_bounds = array<i64: 1, 1, 4, 32>}]} {
    %c0 = arith.constant 0 : index
    %c0_0 = arith.constant 0 : index
    %c0_1 = arith.constant 0 : index
    %c0_2 = arith.constant 0 : index
    %0 = vector.load %arg2[%c0, %c0_0, %c0_1, %c0_2] : memref<1x4x9x16xf32, #tpu.memory_space<vmem>>, vector<1x4x9x16xf32>
    %1 = vector.shape_cast %0 : vector<1x4x9x16xf32> to vector<4x9x16xf32>
    %2 = vector.shape_cast %1 : vector<4x9x16xf32> to vector<36x16xf32>
    %c0_3 = arith.constant 0 : index
    %c0_4 = arith.constant 0 : index
    %3 = vector.load %arg4[%c0_3, %c0_4] : memref<16x16xf32, #tpu.memory_space<vmem>>, vector<16x16xf32>
    %cst = arith.constant dense<0.000000e+00> : vector<36x16xf32>
    %4 = tpu.matmul %2, %3, %cst {dimension_numbers = #tpu.dot_dimension_numbers<[1], [0], [0], [1], [0, 0, 1, 1], [], []>} : vector<36x16xf32>, vector<16x16xf32>, vector<36x16xf32> -> vector<36x16xf32>
    %5 = vector.shape_cast %4 : vector<36x16xf32> to vector<4x9x16xf32>
    %c0_5 = arith.constant 0 : index
    %c0_6 = arith.constant 0 : index
    %c0_7 = arith.constant 0 : index
    %c0_8 = arith.constant 0 : index
    %6 = vector.load %arg3[%c0_5, %c0_6, %c0_7, %c0_8] : memref<1x1x9x16xf32, #tpu.memory_space<vmem>>, vector<1x1x9x16xf32>
    %7 = vector.shape_cast %6 : vector<1x1x9x16xf32> to vector<9x16xf32>
    %c0_9 = arith.constant 0 : index
    %c0_10 = arith.constant 0 : index
    %8 = vector.load %arg4[%c0_9, %c0_10] : memref<16x16xf32, #tpu.memory_space<vmem>>, vector<16x16xf32>
    %cst_11 = arith.constant dense<0.000000e+00> : vector<9x16xf32>
    %9 = tpu.matmul %7, %8, %cst_11 {dimension_numbers = #tpu.dot_dimension_numbers<[1], [0], [0], [1], [0, 0, 1, 1], [], []>} : vector<9x16xf32>, vector<16x16xf32>, vector<9x16xf32> -> vector<9x16xf32>
    %10 = vector.shape_cast %9 : vector<9x16xf32> to vector<1x9x16xf32>
    %11 = vector.extract_strided_slice %5 {offsets = [0, 0, 0], sizes = [4, 9, 8], strides = [1, 1, 1]} : vector<4x9x16xf32> to vector<4x9x8xf32>
    %12 = vector.extract_strided_slice %5 {offsets = [1, 0, 8], sizes = [3, 9, 8], strides = [1, 1, 1]} : vector<4x9x16xf32> to vector<3x9x8xf32>
    %13 = vector.extract_strided_slice %10 {offsets = [0, 0, 8], sizes = [1, 9, 8], strides = [1, 1, 1]} : vector<1x9x16xf32> to vector<1x9x8xf32>
    %14 = tpu.concatenate %12, %13 in 0 : vector<3x9x8xf32>, vector<1x9x8xf32> -> vector<4x9x8xf32>
    %15 = arith.addf %11, %14 : vector<4x9x8xf32>
    %16 = vector.extract_strided_slice %15 {offsets = [0, 0, 0], sizes = [4, 8, 4], strides = [1, 1, 1]} : vector<4x9x8xf32> to vector<4x8x4xf32>
    %17 = vector.extract_strided_slice %15 {offsets = [0, 1, 4], sizes = [4, 8, 4], strides = [1, 1, 1]} : vector<4x9x8xf32> to vector<4x8x4xf32>
    %18 = arith.addf %16, %17 : vector<4x8x4xf32>
    %19 = vector.shape_cast %18 : vector<4x8x4xf32> to vector<4x32xf32>
    %c0_12 = arith.constant 0 : index
    %c0_13 = arith.constant 0 : index
    %20 = vector.load %arg5[%c0_12, %c0_13] : memref<1x32xf32, #tpu.memory_space<vmem>>, vector<1x32xf32>
    %21 = vector.shape_cast %20 : vector<1x32xf32> to vector<32xf32>
    %22 = vector.shape_cast %21 : vector<32xf32> to vector<1x32xf32>
    %23 = vector.broadcast %22 : vector<1x32xf32> to vector<4x32xf32>
    %24 = arith.addf %19, %23 : vector<4x32xf32>
    %cst_14 = arith.constant 0.000000e+00 : f32
    %25 = vector.broadcast %cst_14 : f32 to vector<4x32xf32>
    %26 = arith.cmpf oge, %24, %25 : vector<4x32xf32>
    %cst_15 = arith.constant 0.00999999977 : f32
    %27 = vector.broadcast %cst_15 : f32 to vector<4x32xf32>
    %28 = arith.mulf %27, %24 : vector<4x32xf32>
    %29 = arith.select %26, %24, %28 : vector<4x32xi1>, vector<4x32xf32>
    %c0_16 = arith.constant 0 : index
    %c0_17 = arith.constant 0 : index
    %c0_18 = arith.constant 0 : index
    %c0_19 = arith.constant 0 : index
    %30 = vector.load %arg6[%c0_16, %c0_17, %c0_18, %c0_19] : memref<1x1x4x32xf32, #tpu.memory_space<vmem>>, vector<1x1x4x32xf32>
    %31 = vector.shape_cast %30 : vector<1x1x4x32xf32> to vector<4x32xf32>
    %32 = vector.shape_cast %29 : vector<4x32xf32> to vector<1x1x4x32xf32>
    tpu.vector_store %arg6[%c0_16, %c0_17, %c0_18, %c0_19], %32 {strides = array<i32>} : memref<1x1x4x32xf32, #tpu.memory_space<vmem>>, vector<1x1x4x32xf32>,
    return
  }
  func.func @transform_0(%arg0: i32, %arg1: i32) -> (i32, i32, i32, i32) {
    %c0_i32 = arith.constant 0 : i32
    %c0_i32_0 = arith.constant 0 : i32
    %c0_i32_1 = arith.constant 0 : i32
    return %arg0, %arg1, %c0_i32, %c0_i32_0 : i32, i32, i32, i32
  }
  func.func @transform_1(%arg0: i32, %arg1: i32) -> (i32, i32, i32, i32) {
    %c4_i32 = arith.constant 4 : i32
    %0 = arith.muli %arg1, %c4_i32 : i32
    %c4_i32_0 = arith.constant 4 : i32
    %1 = arith.addi %0, %c4_i32_0 : i32
    %c0_i32 = arith.constant 0 : i32
    %c0_i32_1 = arith.constant 0 : i32
    %c0_i32_2 = arith.constant 0 : i32
    return %arg0, %1, %c0_i32, %c0_i32_1 : i32, i32, i32, i32
  }
  func.func @transform_2(%arg0: i32, %arg1: i32) -> (i32, i32) {
    %c0_i32 = arith.constant 0 : i32
    %c0_i32_0 = arith.constant 0 : i32
    %c0_i32_1 = arith.constant 0 : i32
    return %c0_i32, %c0_i32_0 : i32, i32
  }
  func.func @transform_3(%arg0: i32, %arg1: i32) -> (i32, i32) {
    %c0_i32 = arith.constant 0 : i32
    %c0_i32_0 = arith.constant 0 : i32
    %c0_i32_1 = arith.constant 0 : i32
    return %c0_i32, %c0_i32_0 : i32, i32
  }
  func.func @transform_4(%arg0: i32, %arg1: i32) -> (i32, i32, i32, i32) {
    %c0_i32 = arith.constant 0 : i32
    %c0_i32_0 = arith.constant 0 : i32
    %c0_i32_1 = arith.constant 0 : i32
    return %arg0, %arg1, %c0_i32, %c0_i32_0 : i32, i32, i32, i32
  }
}

</mosaic_0001>

<bundles_post_ra>
// kernel: tpu_custom_call.1
= control target key start
LH: loop header
LB: loop body
LE: loop exit
PB: predicated region body
PF: predicated region fallthrough
CT: control target
= control target key end

     0   :  { %9 = vsyncpa [#allocation3], 0  ;;  %s2948_s0 = inlined_call_operand.vmem [shape: f32[2,9,9,16], index: 0, kind: input, shape index: {}]   ;;  %s2949_s1 = inlined_call_operand.vmem [shape: f32[2,9,9,16], index: 1, kind: input, shape index: {}]   ;;  %s2950_s2 = inlined_call_operand.vmem [shape: f32[16,16], index: 2, kind: input, shape index: {}]   ;;  %s2951_s3 = inlined_call_operand.vmem [shape: f32[1,32], index: 3, kind: input, shape index: {}]   ;;  %s2952_s4 = inlined_call_operand.hbm [shape: f32[2,2,4,32], index: 4, kind: output, shape index: {}]  }
   0x1   :  { %11 = vsyncpa [#allocation3 + $0x1], 0  ;;  %s2301_s15 = smov 0   ;;  %s2303_s16 = smov 0  }
   0x2   :  { %s2305_s17 = smov 0   ;;  %s2307_s18 = smov 0  }
   0x3   :  { %s2309_s19 = smov 0   ;;  %s2311_s20 = smov 0  }
   0x4   :  { %s2313_s21 = smov 0   ;;  %s2315_s22 = smov 0  }
   0x5 LB: > { %s1996_s23 = sadd.s32 4294967295, %s2260_s22   ;;  %s1997_s24 = sadd.s32 4294967294, %s2260_s22   ;;  %s2260_s22 = sphi %s2315_s22, %s17_s22   ;;  %s2256_s21 = sphi %s2313_s21, %s2962_s21   ;;  %s2252_s20 = sphi %s2311_s20, %s2961_s20   ;;  %s2248_s19 = sphi %s2309_s19, %s2960_s19   ;;  %s2244_s18 = sphi %s2307_s18, %s2959_s18   ;;  %s2240_s17 = sphi %s2305_s17, %s2958_s17   ;;  %s2236_s16 = sphi %s2303_s16, %s2957_s16   ;;  %s2232_s15 = sphi %s2301_s15, %s2956_s15  }
   0x6   : > { %s26_s25 = sadd.s32 1, %s2252_s20  ;;  %s29_s26 = sadd.s32 1, %s2256_s21 }
   0x7   : > { %p27_p0 = scmp.ge.s32.totalorder %s26_s25, 2  ;;  %p150_p1 = scmp.ne.s32.totalorder %s2240_s17, %s2236_s16 }
   0x8   : > { %p151_p2 = scmp.eq.s32.totalorder %s1996_s23, 3  ;;  %p156_p5 = scmp.ne.s32.totalorder %s2236_s16, %s2232_s15 }
   0x9   : > { %s2964_s25 = smov (%p27_p0, %s26_s25), 0  ;;  %s2966_s26 = smov (!%p27_p0, %s29_s26), %s2256_s21 }
   0xa   : > { %s136_s27 = ssub.s32 %s2252_s20, %s2964_s25  ;;  %p2352_p3 = por %p151_p2, %p150_p1 }
   0xb   : > { %p31_p4 = scmp.ge.s32.totalorder %s2966_s26, 2  ;;  %p157_p6 = scmp.eq.s32.totalorder %s1997_s24, 3 }
   0xc   : > { %p2002_p7 = scmp.ge.s32.totalorder %s2260_s22, 1  ;;  %p221_p9 = scmp.lt.s32.totalorder %s2260_s22, 5 }
   0xd   : > { %s2968_s26 = smov (%p31_p4, %s2966_s26), 0  ;;  %p2361_p8 = por %p157_p6, %p156_p5 }
   0xe   : > { %s135_s30 = ssub.s32 %s2256_s21, %s2968_s26  ;;  %s140_s5 = sadd.s32 1, %s2240_s17 }
   0xf   : > { %s137_s6 = sor.u32 %s136_s27, %s135_s30  ;;  %p222_p10 = pnand %p2002_p7, %p221_p9 }
  0x10   : > { %p138_p11 = scmp.eq.s32.totalorder %s137_s6, 0  ;;  %v570_v0 = vld [vmem:[%s2950_s2] sm:$0xff] (!%p222_p10)  ;;  %v571_v1 = vld [vmem:[%s2950_s2 + $0x8] sm:$0xff] (!%p222_p10)  ;;  %s2379_s12 = sshll.u32 (!%p222_p10), %s2244_s18, 2  ;;  %v322_v2 = vlaneseq (!%p222_p10)  ;;  %v2262_v3 = vmov (!%p222_p10), 0.0|0.0   ;;  %vm2263_vm0 = vmmov (!%p222_p10), 0  }
  0x11   : > { %225 = sbr.rel (%p222_p10) target bundleno = 737 (0x2e1), region = 36  ;;  %2075 = vmatprep.subr.bf16.mxu1 (!%p222_p10), %v2262_v3  ;;  %v2381_v4 = vpack.c.bf16 (!%p222_p10), %v571_v1, %v570_v0  ;;  %v2264_v5 = vmov (!%p222_p10), 0.0   ;;  %p274_p12 = scmp.lt.s32.totalorder (!%p222_p10), %s2248_s19, 1  ;;  %v2265_v6 = vmov (!%p222_p10), 1966171168   ;;  %2068 = vmatprep.subr.bf16.mxu0 (!%p222_p10), %v2262_v3  ;;  %vm792_vm1 = vcmask (!%p222_p10), 130048  }
  0x12   : > { %s2370_s7 = scalar_select %p138_p11, %s2240_s17, %s140_s5  }
  0x13   : > { %2055 = vmatprep.mubr.msk.f32.mxu1 (!%p222_p10), %vm2263_vm0, %v2264_v5  ;;  %p276_p13 = scmp.lt.s32.totalorder (!%p222_p10), %s2379_s12, 8  ;;  %v320_v7 = vunpack.c.l.s4 (!%p222_p10), %v2265_v6  ;;  %2046 = vmatprep.mubr.msk.f32.mxu0 (!%p222_p10), %vm2263_vm0, %v2264_v5  ;;  %v323_v8 = vshrl.u32 (!%p222_p10), %v322_v2, 7  ;;  %s290_s27 = sadd.s32 (!%p222_p10), 4, %s2379_s12  ;;  %vm1852_vm2 = vcmask (!%p222_p10), 31744   ;;  %vm1854_vm3 = vcmask (!%p222_p10), 64512  }
  0x14   : > { %2076 = vmatpush3.bf16.msra.mxu1 (!%p222_p10), %v2381_v4  ;;  %2070 = vmatpush3.bf16.msra.mxu0 (!%p222_p10), %v2381_v4  ;;  %p2409_p0 = scmp.lt.s32.totalorder (!%p222_p10), %s290_s27, 8  ;;  %s2269_s6 = smov (!%p222_p10), 12   ;;  %vm1856_vm4 = vcmask (!%p222_p10), 97280   ;;  %vm1859_vm5 = vcmask (!%p222_p10), 162816   ;;  %vm1861_vm6 = vcmask (!%p222_p10), 195584   ;;  %vm1863_vm7 = vcmask (!%p222_p10), 228352  }
  0x15   : > { %v321_v9 = vunpack.c.0.s8 (!%p222_p10), %v320_v7  ;;  %2072 = vmatprep.subr.bf16.mxu1 (!%p222_p10), %v2381_v4  ;;  %s2270_s8 = smov (!%p222_p10), 8   ;;  %s2272_s10 = smov (!%p222_p10), 16   ;;  %vm1876_vm9 = vcmask (!%p222_p10), 257024  }
  0x17   : > { %v2400_v10 = vsub.s32 (!%p222_p10), %v321_v9, %v323_v8 }
  0x18   : > { %s2391_s13 = scalar_select %p274_p12, %s2248_s19, 1 }
  0x19   : > { %s277_s14 = scalar_select %p276_p13, %s2379_s12, 8 }
  0x1a   : > { %s2077_s23 = smul.u32 18, %s2391_s13  ;;  %s2970_s27 = smov (!%p2409_p0, %s290_s27), 8 }
  0x1b   : > { %s2005_s24 = sshll.u32 %s277_s14, 1  ;;  %s2008_s11 = sshll.u32 %s2970_s27, 1 }
  0x1c   : > { %s280_s30 = sadd.s32 %s2077_s23, %s2005_s24  ;;  %s297_s12 = sadd.s32 %s2077_s23, %s2008_s11 }
  0x1d   : > { %s2006_s5 = sshll.u32 %s280_s30, 3  ;;  %s2009_s13 = sshll.u32 %s297_s12, 3 }
  0x1e   : > { %s2405_s9 = scalar_lea.vmem %s2948_s0, %s2006_s5  ;;  %s299_s24 = scalar_lea.vmem %s2949_s1, %s2009_s13 }
  0x1f   : > { %v2414_v11 = vld [vmem:[%s2405_s9 + $0x20] sm:$0xff]  ;;  %v2012_v12 = vld.sshfl [vmem:[%s2405_s9 + $0x28] sm:$0x1 pattern:$0x75316420]  ;;  %v308_v13 = vld [vmem:[%s2405_s9 + $0x30] sm:$0xff] }
  0x20   : > { %v444_v14 = vcombine.high %v2414_v11, %v2414_v11  ;;  %v506_v15 = vrot.slane %v2012_v12, %v2400_v10  ;;  %v507_v16 = vcombine.high %v308_v13, %v308_v13  ;;  %v514_v17 = vrot.slane %v308_v13, %v2400_v10  ;;  %v302_v18 = vld [vmem:[%s2405_s9] sm:$0xff]  ;;  %v2013_v19 = vld.sshfl [vmem:[%s2405_s9 + $0x38] sm:$0x1 pattern:$0x75316420]  ;;  %v304_v20 = vld [vmem:[%s2405_s9 + $0x10] sm:$0xff] }
  0x21   : > { %v318_v21 = vcombine.high %v302_v18, %v302_v18  ;;  %v325_v22 = vrot.slane %v302_v18, %v2400_v10  ;;  %v569_v23 = vrot.slane %v2013_v19, %v2400_v10  ;;  %v2428_v24 = vld.sshfl [vmem:[%s2405_s9 + $0x8] sm:$0x1 pattern:$0x75316420]  ;;  %v381_v25 = vcombine.high %v304_v20, %v304_v20  ;;  %s2266_s27 = smov 120   ;;  %s2267_s30 = smov 124  }
  0x22   : > { %v458_v26 = vrot.slane %v444_v14, %v2400_v10  ;;  %v521_v27 = vrot.slane %v507_v16, %v2400_v10  ;;  %v522_v28 = vcombine.high %v514_v17, %v514_v17  ;;  %v530_v29 = vrot.slane %v514_v17, %v2400_v10  ;;  %v2011_v14 = vld.sshfl [vmem:[%s2405_s9 + $0x18] sm:$0x1 pattern:$0x75316420]  ;;  %s2268_s5 = smov 4   ;;  %s2271_s9 = smov 20  }
  0x23   : > { %v332_v30 = vrot.slane %v318_v21, %v2400_v10  ;;  %v333_v31 = vcombine.high %v325_v22, %v325_v22  ;;  %v341_v32 = vrot.slane %v325_v22, %v2400_v10  ;;  %v380_v33 = vrot.slane %v2428_v24, %v2400_v10  ;;  %s2273_s11 = smov 24   ;;  %s2274_s12 = smov 28  }
  0x24   : > { %v460_v34 = vcombine.high %v458_v26, %v458_v26  ;;  %v2438_v35 = vrot.slane %v458_v26, %v2400_v10  ;;  %v537_v36 = vrot.slane %v521_v27, %v2400_v10  ;;  %v544_v37 = vrot.slane %v522_v28, %v2400_v10  ;;  %s265_s13 = sand.u32 1, %s2236_s16   ;;  %s2027_s23 = sshll.u32 %s2248_s19, 1 }
  0x25   : > { %v552_v38 = vcombine.high %v530_v29, %v530_v29  ;;  %v720_v39 = vcombine.low %v506_v15, %v530_v29  ;;  %v334_v40 = vcombine.high %v332_v30, %v332_v30  ;;  %v348_v41 = vrot.slane %v332_v30, %v2400_v10  ;;  %s2003_s14 = sshll.u32 %s265_s13, 2 }
  0x26   : > { %v2450_v42 = vrot.slane %v460_v34, %v2400_v10  ;;  %v554_v43 = vcombine.high %v544_v37, %v544_v37  ;;  %v355_v44 = vrot.slane %v333_v31, %v2400_v10  ;;  %v523_v45 = vcombine.high %v521_v27, %v521_v27 }
  0x27   : > { %v721_v46 = vcombine.low %v544_v37, %v552_v38  ;;  %v736_v47 = vrot.slane %v720_v39, %v2400_v10  ;;  %v362_v48 = vrot.slane %v334_v40, %v2400_v10  ;;  %v553_v49 = vcombine.high %v537_v36, %v537_v36 }
  0x28   : > { %v2017_v50 = vcombine.high %v2438_v35, %v2450_v42  ;;  %v722_v51 = vcombine.low %v554_v43, %v537_v36  ;;  %v572_v52 = vcombine.low %v341_v32, %v355_v44  ;;  %v2014_v53 = vcombine.high %v341_v32, %v355_v44 }
  0x29   : > { %v743_v54 = vrot.slane %v721_v46, %v2400_v10  ;;  %v574_v55 = vcombine.low %v348_v41, %v362_v48  ;;  %v2015_v56 = vcombine.high %v348_v41, %v362_v48  ;;  %v551_v57 = vrot.slane %v523_v45, %v2400_v10 }
  0x2a   : > { %v729_v58 = vrot.slane %v2017_v50, %v2400_v10  ;;  %v750_v59 = vrot.slane %v722_v51, %v2400_v10  ;;  %v582_v60 = vrot.slane %v572_v52, %v2400_v10  ;;  %v589_v61 = vrot.slane %v2014_v53, %v2400_v10  ;;  %v1155_v51 = vld [vmem:[%s299_s24 + $0x8] sm:$0x1] }
  0x2b   : > { %v596_v62 = vrot.slane %v574_v55, %v2400_v10  ;;  %v603_v63 = vrot.slane %v2015_v56, %v2400_v10  ;;  %v555_v0 = vcombine.high %v551_v57, %v551_v57  ;;  %v768_v1 = vcombine.low %v551_v57, %v553_v49 }
  0x2c   : > { %v751_v2 = vcombine.low %v729_v58, %v736_v47  ;;  %v752_v3 = vcombine.low %v743_v54, %v750_v59  ;;  %v604_v6 = vcombine.low %v582_v60, %v589_v61  ;;  %v388_v7 = vrot.slane %v304_v20, %v2400_v10 }
  0x2d   : > { %v605_v8 = vcombine.low %v596_v62, %v603_v63  ;;  %v769_v9 = vcombine.low %v555_v0, %v569_v23  ;;  %v776_v12 = vrot.slane %v768_v1, %v2400_v10  ;;  %v395_v13 = vrot.slane %v381_v25, %v2400_v10 }
  0x2e   : > { %v759_v15 = vrot.slane %v751_v2, %v2400_v10  ;;  %v766_v16 = vrot.slane %v752_v3, %v2400_v10  ;;  %v612_v17 = vrot.slane %v604_v6, %v2400_v10  ;;  %v396_v18 = vcombine.high %v388_v7, %v388_v7 }
  0x2f   : > { %v619_v19 = vrot.slane %v605_v8, %v2400_v10  ;;  %v783_v21 = vrot.slane %v769_v9, %v2400_v10  ;;  %v397_v20 = vcombine.high %v395_v13, %v395_v13  ;;  %v404_v22 = vrot.slane %v388_v7, %v2400_v10 }
  0x30   : > { %v767_v23 = vcombine.low %v759_v15, %v766_v16  ;;  %v411_v26 = vrot.slane %v395_v13, %v2400_v10  ;;  %v418_v25 = vrot.slane %v396_v18, %v2400_v10  ;;  %v443_v27 = vrot.slane %v2011_v14, %v2400_v10 }
  0x31   : > { %v620_v28 = vcombine.low %v612_v17, %v619_v19  ;;  %v784_v29 = vcombine.low %v776_v12, %v783_v21  ;;  %v425_v30 = vrot.slane %v397_v20, %v2400_v10  ;;  %v426_v31 = vcombine.high %v404_v22, %v404_v22 }
  0x32   : > { %2056 = vmatmul.mubr.msk.f32.vlgmr.msra.gmra.mrb[0].mxu1 %vm792_vm1, %v767_v23  ;;  %v427_v32 = vcombine.high %v411_v26, %v411_v26  ;;  %v428_v34 = vcombine.high %v418_v25, %v418_v25  ;;  %v621_v36 = vcombine.low %v380_v33, %v404_v22  ;;  %v451_v37 = vrot.slane %v2414_v11, %v2400_v10  ;;  %v1154_v33 = vld [vmem:[%s299_s24] sm:$0xff] }
  0x33   : > { %2047 = vmatmul.mubr.msk.f32.vlgmr.msra.gmra.mrb[0].mxu0 %vm792_vm1, %v620_v28  ;;  %2058 = vmatprep.mubr.msk.f32.mxu1 %vm2263_vm0, %v2264_v5  ;;  %v791_v38 = vrot.slane %v784_v29, %v2400_v10  ;;  %v622_v39 = vcombine.low %v418_v25, %v426_v31  ;;  %v429_v40 = vcombine.high %v425_v30, %v425_v30 }
  0x34   : > { %2049 = vmatprep.mubr.msk.f32.mxu0 %vm2263_vm0, %v2264_v5  ;;  %v623_v41 = vcombine.low %v428_v34, %v411_v26  ;;  %v624_v43 = vcombine.low %v425_v30, %v427_v32  ;;  %v631_v24 = vrot.slane %v621_v36, %v2400_v10  ;;  %2074 = vmatpush3.bf16.msra.mxu1 %v2381_v4 }
  0x35   : > { %v638_v11 = vrot.slane %v622_v39, %v2400_v10  ;;  %v459_v44 = vcombine.high %v451_v37, %v451_v37  ;;  %v467_v45 = vrot.slane %v451_v37, %v2400_v10  ;;  %v670_v46 = vcombine.low %v429_v40, %v443_v27 }
  0x36   : > { %2059 = vmatmul.mubr.msk.f32.gmra.mrb[2].mxu1 %vm792_vm1, %v791_v38  ;;  %v645_v47 = vrot.slane %v623_v41, %v2400_v10  ;;  %v652_v48 = vrot.slane %v624_v43, %v2400_v10  ;;  %v673_v49 = vcombine.low %v2438_v35, %v2450_v42 }
  0x37   : > { %v653_v50 = vcombine.low %v631_v24, %v638_v11  ;;  %2065 = vmatprep.mubr.msk.f32.mxu1 %vm792_vm1, %v1154_v33  ;;  %v481_v4 = vrot.slane %v459_v44, %v2400_v10  ;;  %v680_v53 = vrot.slane %v670_v46, %v2400_v10 }
  0x38   : > { %v654_v52 = vcombine.low %v645_v47, %v652_v48  ;;  %v701_v57 = vrot.slane %v673_v49, %v2400_v10 }
  0x39   : > { %v661_v54 = vrot.slane %v653_v50, %v2400_v10  ;;  %v671_v55 = vcombine.low %v467_v45, %v481_v4  ;;  %v2016_v56 = vcombine.high %v467_v45, %v481_v4 }
  0x3a   : > { %v668_v58 = vrot.slane %v654_v52, %v2400_v10  ;;  %2066 = vmatmul.mubr.msk.f32.vlgmr.msra.gmra.mrb[4].mxu1 %vm792_vm1, %v1155_v51 }
  0x3b   : > { %v687_v35 = vrot.slane %v671_v55, %v2400_v10  ;;  %v694_v42 = vrot.slane %v2016_v56, %v2400_v10 }
  0x3c   : > { %v669_v59 = vcombine.low %v661_v54, %v668_v58 }
  0x3d   : > { %v702_v60 = vcombine.low %v680_v53, %v687_v35  ;;  %v703_v61 = vcombine.low %v694_v42, %v701_v57 }
  0x3e   : > { %2050 = vmatmul.mubr.msk.f32.gmra.mrb[2].mxu0 %vm792_vm1, %v669_v59 }
  0x3f   : > { %2052 = vmatprep.mubr.msk.f32.mxu0 %vm2263_vm0, %v2264_v5  ;;  %v710_v62 = vrot.slane %v702_v60, %v2400_v10  ;;  %v717_v63 = vrot.slane %v703_v61, %v2400_v10 }
  0x41   : > { %v718_v0 = vcombine.low %v710_v62, %v717_v63 }
  0x43   : > { %2053 = vmatmul.mubr.msk.f32.gmra.mrb[4].mxu0 %vm792_vm1, %v718_v0 }
 0x105   : > { %v884_v1 = vpop.f32.mrb[0].mxu1 }
 0x106   : > { %v1045_v2 = vcombine.high %v884_v1, %v884_v1  ;;  %v1052_v3 = vrot.slane %v884_v1, %v2400_v10  ;;  %v2057_v6 = vpop.f32.mrb[1].mxu1  ;;  %v2522_v7 = vpop.f32.mrb[0].mxu0 }
 0x107   : > { %v2048_v8 = vpop.f32.mrb[1].mxu0 }
 0x108   : > { %v1059_v9 = vrot.slane %v1045_v2, %v2400_v10  ;;  %v1060_v12 = vcombine.high %v1052_v3, %v1052_v3  ;;  %v2526_v5 = vrot.slane %v1052_v3, %v2400_v10 }
 0x109   : > { %v889_v13 = vpop.f32.mrb[2].mxu1 }
 0x10a   : > { %v2529_v14 = vrot.slane %v1059_v9, %v2400_v10  ;;  %1332 = vrot.lane.b32.xlu1 %v2526_v5, %s2266_s27  ;;  %v1100_v15 = vrot.slane %v889_v13, %v2400_v10  ;;  %v2060_v16 = vpop.f32.mrb[3].mxu1  ;;  %v2535_v17 = vrot.slane %v1060_v12, %v2400_v10  ;;  %v1061_v22 = vcombine.high %v1059_v9, %v1059_v9 }
 0x10b   : > { %v2550_v23 = vcombine.high %v2526_v5, %v2526_v5 }
 0x10c   : > { %v2539_v18 = vcombine.high %v2529_v14, %v2529_v14  ;;  %v2542_v21 = vrot.slane %v1100_v15, %v2400_v10  ;;  %v2560_v31 = vrot.slane %v1061_v22, %v2400_v10  ;;  %v1101_v41 = vcombine.high %v1100_v15, %v1100_v15 }
 0x10d   : > { %v2067_v19 = vpop.f32.mrb[4].mxu1 }
 0x10e   : > { %1334 = vrot.lane.b32.xlu1 %v2535_v17, %s2266_s27  ;;  %1344 = vrot.lane.b32.xlu0 %v2539_v18, %s2266_s27  ;;  %v1228_v20 = vpop.f32.mrb[5].mxu1  ;;  %v1294_v28 = vrot.slane %v2067_v19, %v2400_v10  ;;  %v2577_v24 = vcombine.high %v2560_v31, %v2560_v31  ;;  %v2587_v46 = vrot.slane %v1101_v41, %v2400_v10 }
 0x10f   : > { %v1246_v29 = vrot.slane %v1228_v20, %v2400_v10  ;;  %v1239_v36 = vcombine.high %v1228_v20, %v1228_v20  ;;  %v2594_v49 = vcombine.high %v2542_v21, %v2542_v21 }
 0x110   : > { %v1301_v32 = vrot.slane %v1294_v28, %v2400_v10  ;;  %v2648_v3 = vcombine.high %v2587_v46, %v2587_v46 }
 0x111   : > { %v874_v26 = vpop.f32.mrb[2].mxu0  ;;  %v2569_v37 = vrot.slane %v1246_v29, %v2400_v10  ;;  %v1253_v43 = vrot.slane %v1239_v36, %v2400_v10  ;;  %v1254_v48 = vcombine.high %v1246_v29, %v1246_v29 }
 0x112   : > { %v947_v25 = vcombine.high %v874_v26, %v874_v26  ;;  %v2051_v27 = vpop.f32.mrb[3].mxu0  ;;  %1336 = vrot.lane.b32.xlu1 %v2550_v23, %s2266_s27  ;;  %1348 = vrot.lane.b32.xlu0 %v2542_v21, %s2266_s27  ;;  %v954_v44 = vrot.slane %v874_v26, %v2400_v10 }
 0x113   : > { %v1284_v11 = vcombine.high %v2569_v37, %v2569_v37  ;;  %v1269_v47 = vrot.slane %v1253_v43, %v2400_v10  ;;  %v1276_v54 = vrot.slane %v1254_v48, %v2400_v10  ;;  %v1255_v58 = vcombine.high %v1253_v43, %v1253_v43 }
 0x114   : > { %v961_v30 = vrot.slane %v947_v25, %v2400_v10  ;;  %v962_v50 = vcombine.high %v954_v44, %v954_v44  ;;  %v2597_v51 = vrot.slane %v954_v44, %v2400_v10  ;;  %v905_v27 = vrot.slane %v2522_v7, %v2400_v10 }
 0x115   : > { %v1286_v42 = vcombine.high %v1276_v54, %v1276_v54  ;;  %v1283_v60 = vrot.slane %v1255_v58, %v2400_v10  ;;  %v1285_v63 = vcombine.high %v1269_v47, %v1269_v47 }
 0x116   : > { %1342 = vrot.lane.b32.xlu1 %v2560_v31, %s2266_s27  ;;  %v2566_v34 = vrot.slane %v961_v30, %v2400_v10  ;;  %v879_v38 = vpop.f32.mrb[4].mxu0  ;;  %v2605_v53 = vrot.slane %v962_v50, %v2400_v10  ;;  %v2610_v55 = vcombine.high %v2597_v51, %v2597_v51  ;;  %v963_v57 = vcombine.high %v961_v30, %v961_v30 }
 0x117   : > { %v996_v39 = vcombine.high %v879_v38, %v879_v38  ;;  %v2054_v40 = vpop.f32.mrb[5].mxu0  ;;  %v1003_v61 = vrot.slane %v879_v38, %v2400_v10  ;;  %v1287_v6 = vcombine.high %v1283_v60, %v1283_v60 }
 0x118   : > { %1308 = vrot.lane.b32.xlu0 %v2566_v34, %s2266_s27  ;;  %v2619_v35 = vcombine.high %v2605_v53, %v2605_v53  ;;  %v2626_v59 = vrot.slane %v963_v57, %v2400_v10  ;;  %v2635_v62 = vcombine.high %v2566_v34, %v2566_v34 }
 0x119   : > { %v1010_v33 = vrot.slane %v996_v39, %v2400_v10  ;;  %v2639_v0 = vrot.slane %v1003_v61, %v2400_v10  ;;  %v1011_v2 = vcombine.high %v1003_v61, %v1003_v61 }
 0x11a   : > { %1372 = vrot.lane.b32.xlu1 %v1301_v32, %s2266_s27  ;;  %v995_v12 = vcombine.high %v2626_v59, %v2626_v59  ;;  %v913_v32 = vcombine.high %v905_v27, %v905_v27 }
 0x11b   : > { %v1012_v45 = vcombine.high %v1010_v33, %v1010_v33  ;;  %v1026_v4 = vrot.slane %v1010_v33, %v2400_v10  ;;  %v1033_v8 = vrot.slane %v1011_v2, %v2400_v10 }
 0x11c   : > { %1346 = vrot.lane.b32.xlu0 %v2577_v24, %s2266_s27  ;;  %v2686_v39 = vrot.slane %v913_v32, %v2400_v10 }
 0x11d   : > { %v1040_v52 = vrot.slane %v1012_v45, %v2400_v10  ;;  %v2613_v56 = vcombine.high %v1026_v4, %v1026_v4  ;;  %v2656_v9 = vcombine.high %v1033_v8, %v1033_v8 }
 0x11e   : > { %1360 = vrot.lane.b32.xlu1 %v1284_v11, %s2266_s27  ;;  %v945_v43 = vcombine.high %v2686_v39, %v2686_v39 }
 0x11f   : > { %v1044_v1 = vcombine.high %v1040_v52, %v1040_v52 }
 0x120   : > { %1350 = vrot.lane.b32.xlu0 %v2587_v46, %s2266_s27 }
 0x122   : > { %1364 = vrot.lane.b32.xlu1 %v1269_v47, %s2266_s27 }
 0x124   : > { %1352 = vrot.lane.b32.xlu0 %v2594_v49, %s2266_s27 }
 0x126   : > { %1326 = vrot.lane.b32.xlu1 %v1040_v52, %s2266_s27 }
 0x128   : > { %1304 = vrot.lane.b32.xlu0 %v2610_v55, %s2266_s27 }
 0x12a   : > { %1328 = vrot.lane.b32.xlu1 %v2613_v56, %s2266_s27 }
 0x12c   : > { %1306 = vrot.lane.b32.xlu0 %v2619_v35, %s2266_s27 }
 0x12e   : > { %1362 = vrot.lane.b32.xlu1 %v1286_v42, %s2266_s27 }
 0x130   : > { %1310 = vrot.lane.b32.xlu0 %v2626_v59, %s2266_s27 }
 0x132   : > { %1366 = vrot.lane.b32.xlu1 %v1283_v60, %s2266_s27 }
 0x134   : > { %1312 = vrot.lane.b32.xlu0 %v2635_v62, %s2266_s27 }
 0x136   : > { %1368 = vrot.lane.b32.xlu1 %v1285_v63, %s2266_s27 }
 0x138   : > { %1316 = vrot.lane.b32.xlu0 %v2639_v0, %s2266_s27 }
 0x13a   : > { %1330 = vrot.lane.b32.xlu1 %v1044_v1, %s2266_s27 }
 0x13c   : > { %1354 = vrot.lane.b32.xlu0 %v2648_v3, %s2266_s27 }
 0x13e   : > { %1370 = vrot.lane.b32.xlu1 %v1287_v6, %s2266_s27 }
 0x140   : > { %1324 = vrot.lane.b32.xlu0 %v1026_v4, %s2266_s27 }
 0x142   : > { %1322 = vrot.lane.b32.xlu1 %v2656_v9, %s2266_s27 }
 0x144   : > { %1314 = vrot.lane.b32.xlu0 %v995_v12, %s2266_s27 }
 0x146   : > { %1358 = vrot.lane.b32.xlu1 %v1276_v54, %s2266_s27 }
 0x148   : > { %1318 = vrot.lane.b32.xlu0 %v1033_v8, %s2266_s27 }
 0x14c   : > { %1340 = vrot.lane.b32.xlu0 %v2529_v14, %s2266_s27 }
 0x17c   : > { %v1333_v13 = vpop.permute.xlu1 %1332 }
 0x17d   : > { %v2667_v15 = vadd.f32 %v1333_v13, %v995_v12 }
 0x17f   : > { %1504 = vrot.lane.b32.xlu1 %v2667_v15, %s2267_s30 }
 0x180   : > { %v1335_v16 = vpop.permute.xlu1 %1334  ;;  %v1345_v19 = vpop.permute.xlu0 %1344 }
 0x181   : > { %v2672_v20 = vadd.f32 %v1335_v16, %v2639_v0  ;;  %v2683_v36 = vadd.f32 %v1345_v19, %v1040_v52  ;;  %v2713_v52 = vrot.slane %v905_v27, %v2400_v10 }
 0x183   : > { %1506 = vrot.lane.b32.xlu1 %v2672_v20, %s2267_s30 }
 0x184   : > { %v1337_v22 = vpop.permute.xlu1 %1336  ;;  %v1349_v26 = vpop.permute.xlu0 %1348 }
 0x185   : > { %v1427_v25 = vadd.f32 %v1337_v22, %v1033_v8  ;;  %v2690_v40 = vadd.f32 %v1349_v26, %v1044_v1 }
 0x187   : > { %1508 = vrot.lane.b32.xlu1 %v1427_v25, %s2267_s30 }
 0x188   : > { %v1343_v28 = vpop.permute.xlu1 %1342 }
 0x189   : > { %v2679_v29 = vadd.f32 %v1343_v28, %v1026_v4  ;;  %v898_v4 = vcombine.high %v2522_v7, %v2522_v7 }
 0x18a   : > { %v1309_v30 = vpop.permute.xlu0 %1308 }
 0x18b   : > { %1512 = vrot.lane.b32.xlu0 %v2679_v29, %s2267_s30  ;;  %v2696_v33 = vadd.f32 %v1309_v30, %v945_v43  ;;  %v912_v57 = vrot.slane %v898_v4, %v2400_v10 }
 0x18c   : > { %v2708_v48 = vpop.permute.xlu1 %1372 }
 0x18d   : > { %v928_v60 = vrot.slane %v912_v57, %v2400_v10  ;;  %v914_v61 = vcombine.high %v912_v57, %v912_v57 }
 0x18e   : > { %v1347_v38 = vpop.permute.xlu0 %1346 }
 0x18f   : > { %1514 = vrot.lane.b32.xlu0 %v2683_v36, %s2267_s30  ;;  %v2701_v44 = vadd.f32 %v1347_v38, %v2613_v56  ;;  %v942_v6 = vrot.slane %v914_v61, %v2400_v10  ;;  %v944_v25 = vcombine.high %v928_v60, %v928_v60 }
 0x190   : > { %v1361_v58 = vpop.permute.xlu1 %1360 }
 0x191   : > { %v946_v13 = vcombine.high %v942_v6, %v942_v6  ;;  %v2749_v30 = vadd.f32 %v1361_v58, %v2560_v31 }
 0x192   : > { %v1351_v41 = vpop.permute.xlu0 %1350 }
 0x193   : > { %1518 = vrot.lane.b32.xlu0 %v2690_v40, %s2267_s30  ;;  %v2706_v47 = vadd.f32 %v1351_v41, %v2526_v5  ;;  %v943_v5 = vcombine.high %v2713_v52, %v2713_v52 }
 0x194   : > { %v1365_v1 = vpop.permute.xlu1 %1364 }
 0x195   : > { %v2758_v38 = vadd.f32 %v1365_v1, %v2577_v24 }
 0x196   : > { %v1353_v11 = vpop.permute.xlu0 %1352 }
 0x197   : > { %1482 = vrot.lane.b32.xlu0 %v2696_v33, %s2267_s30  ;;  %v2718_v54 = vadd.f32 %v1353_v11, %v2535_v17 }
 0x198   : > { %v1327_v16 = vpop.permute.xlu1 %1326 }
 0x199   : > { %v2765_v31 = vadd.f32 %v1327_v16, %v2566_v34 }
 0x19a   : > { %v1305_v45 = vpop.permute.xlu0 %1304 }
 0x19b   : > { %1516 = vrot.lane.b32.xlu0 %v2701_v44, %s2267_s30 }
 0x19c   : > { %v1329_v27 = vpop.permute.xlu1 %1328 }
 0x19e   : > { %v1307_v50 = vpop.permute.xlu0 %1306 }
 0x19f   : > { %1520 = vrot.lane.b32.xlu0 %v2706_v47, %s2267_s30  ;;  %v2725_v7 = vadd.f32 %v1307_v50, %v943_v5  ;;  %v2772_v50 = vadd.f32 %v1329_v27, %v2626_v59  ;;  %v1411_v59 = vadd.f32 %v1305_v45, %v2686_v39 }
 0x1a0   : > { %v1363_v43 = vpop.permute.xlu1 %1362 }
 0x1a1   : > { %v1440_v34 = vadd.f32 %v1363_v43, %v2539_v18 }
 0x1a2   : > { %v1311_v56 = vpop.permute.xlu0 %1310 }
 0x1a3   : > { %1522 = vrot.lane.b32.xlu0 %v2718_v54, %s2267_s30  ;;  %v2730_v63 = vadd.f32 %v1311_v56, %v928_v60 }
 0x1a4   : > { %v1367_v24 = vpop.permute.xlu1 %1366 }
 0x1a5   : > { %v2788_v4 = vadd.f32 %v1367_v24, %v2542_v21 }
 0x1a6   : > { %v1313_v42 = vpop.permute.xlu0 %1312 }
 0x1a7   : > { %1480 = vrot.lane.b32.xlu0 %v2725_v7, %s2267_s30  ;;  %v2735_v8 = vadd.f32 %v1313_v42, %v942_v6 }
 0x1aa   : > { %v1317_v2 = vpop.permute.xlu0 %1316 }
 0x1ab   : > { %1484 = vrot.lane.b32.xlu0 %v2730_v63, %s2267_s30  ;;  %v2739_v19 = vadd.f32 %v1317_v2, %v946_v13 }
 0x1ae   : > { %v1355_v12 = vpop.permute.xlu0 %1354 }
 0x1af   : > { %1486 = vrot.lane.b32.xlu0 %v2735_v8, %s2267_s30  ;;  %v1436_v11 = vadd.f32 %v1355_v12, %v2550_v23  ;;  %v2781_v23 = vcombine.high %v2535_v17, %v2535_v17 }
 0x1b2   : > { %v1325_v22 = vpop.permute.xlu0 %1324 }
 0x1b3   : > { %v2742_v26 = vadd.f32 %v1325_v22, %v2619_v35  ;;  %1490 = vrot.lane.b32.xlu0 %v2739_v19, %s2267_s30 }
 0x1b5   : > { %1496 = vrot.lane.b32.xlu1 %v2742_v26, %s2267_s30 }
 0x1b6   : > { %v1315_v28 = vpop.permute.xlu0 %1314 }
 0x1b7   : > { %v2751_v32 = vadd.f32 %v1315_v28, %v944_v25 }
 0x1b9   : > { %1528 = vrot.lane.b32.xlu1 %v2749_v30, %s2267_s30  ;;  %1488 = vrot.lane.b32.xlu0 %v2751_v32, %s2267_s30 }
 0x1ba   : > { %v1319_v35 = vpop.permute.xlu0 %1318 }
 0x1bb   : > { %v1418_v41 = vadd.f32 %v1319_v35, %v2597_v51  ;;  %v1369_v51 = vpop.permute.xlu1 %1368 }
 0x1bc   : > { %v2794_v17 = vadd.f32 %v1369_v51, %v2587_v46  ;;  %v1445_v46 = vadd.f32 %v2708_v48, %v2648_v3 }
 0x1bd   : > { %1532 = vrot.lane.b32.xlu1 %v2758_v38, %s2267_s30  ;;  %1492 = vrot.lane.b32.xlu0 %v1418_v41, %s2267_s30 }
 0x1be   : > { %v1341_v56 = vpop.permute.xlu0 %1340 }
 0x1bf   : > { %v1331_v18 = vpop.permute.xlu1 %1330  ;;  %v1429_v57 = vadd.f32 %v1341_v56, %v2656_v9  ;;  %v2815_v9 = vcombine.high %v2639_v0, %v2639_v0 }
 0x1c0   : > { %v2801_v21 = vadd.f32 %v1331_v18, %v2635_v62 }
 0x1c1   : > { %1498 = vrot.lane.b32.xlu1 %v2765_v31, %s2267_s30  ;;  %1524 = vrot.lane.b32.xlu0 %v1436_v11, %s2267_s30 }
 0x1c3   : > { %v1371_v39 = vpop.permute.xlu1 %1370 }
 0x1c4   : > { %v2806_v45 = vadd.f32 %v1371_v39, %v2594_v49 }
 0x1c5   : > { %1500 = vrot.lane.b32.xlu1 %v2772_v50, %s2267_s30  ;;  %1302 = vrot.lane.b32.xlu0 %v2605_v53, %s2266_s27 }
 0x1c7   : > { %v1323_v62 = vpop.permute.xlu1 %1322 }
 0x1c8   : > { %v1420_v49 = vadd.f32 %v1323_v62, %v2610_v55 }
 0x1c9   : > { %1530 = vrot.lane.b32.xlu1 %v1440_v34, %s2267_s30  ;;  %1338 = vrot.lane.b32.xlu0 %v2781_v23, %s2266_s27 }
 0x1cb   : > { %v1359_v5 = vpop.permute.xlu1 %1358 }
 0x1cc   : > { %v1438_v3 = vadd.f32 %v1359_v5, %v2529_v14 }
 0x1cd   : > { %1534 = vrot.lane.b32.xlu1 %v2788_v4, %s2267_s30  ;;  %1478 = vrot.lane.b32.xlu0 %v1411_v59, %s2267_s30 }
 0x1d1   : > { %1536 = vrot.lane.b32.xlu1 %v2794_v17, %s2267_s30  ;;  %1510 = vrot.lane.b32.xlu0 %v1429_v57, %s2267_s30 }
 0x1d5   : > { %1502 = vrot.lane.b32.xlu1 %v2801_v21, %s2267_s30 }
 0x1d9   : > { %1538 = vrot.lane.b32.xlu1 %v2806_v45, %s2267_s30 }
 0x1dd   : > { %1540 = vrot.lane.b32.xlu1 %v1445_v46, %s2267_s30 }
 0x1e1   : > { %1320 = vrot.lane.b32.xlu1 %v2815_v9, %s2266_s27 }
 0x1e5   : > { %1356 = vrot.lane.b32.xlu1 %v2569_v37, %s2266_s27 }
 0x1e9   : > { %1494 = vrot.lane.b32.xlu1 %v1420_v49, %s2267_s30 }
 0x1ed   : > { %1526 = vrot.lane.b32.xlu1 %v1438_v3, %s2267_s30  ;;  %s1890_s30 = sadd.s32 %s2244_s18, %s2027_s23  ;;  %s1879_s18 = scalar_lea.sflag [#allocation3], %s265_s13 }
 0x1f1   : > { %v1505_v61 = vpop.permute.xlu1 %1504 }
 0x1f5   : > { %v2825_v2 = vpop.permute.xlu1 %1506 }
 0x1f9   : > { %v2829_v37 = vpop.permute.xlu1 %1508 }
 0x1fd   : > { %v1513_v48 = vpop.permute.xlu0 %1512 }
 0x1fe   : > { %v1591_v25 = vadd.f32 %v1513_v48, %v1429_v57 }
 0x201   : > { %v1515_v58 = vpop.permute.xlu0 %1514 }
 0x205   : > { %v1519_v0 = vpop.permute.xlu0 %1518 }
 0x209   : > { %v1483_v42 = vpop.permute.xlu0 %1482 }
 0x20a   : > { %v1576_v48 = vadd.f32 %v1483_v42, %v2725_v7 }
 0x20d   : > { %v1517_v60 = vpop.permute.xlu0 %1516 }
 0x20e   : > { %v1593_v46 = vadd.f32 %v1517_v60, %v2683_v36 }
 0x211   : > { %v1521_v1 = vpop.permute.xlu0 %1520 }
 0x215   : > { %v2827_v6 = vpop.permute.xlu0 %1522 }
 0x219   : > { %v1481_v55 = vpop.permute.xlu0 %1480 }
 0x21a   : > { %v1575_v16 = vadd.f32 %v1481_v55, %v1411_v59 }
 0x21d   : > { %v1485_v14 = vpop.permute.xlu0 %1484 }
 0x21e   : > { %v1577_v62 = vadd.f32 %v1485_v14, %v2696_v33 }
 0x221   : > { %v1487_v24 = vpop.permute.xlu0 %1486 }
 0x225   : > { %v1491_v59 = vpop.permute.xlu0 %1490 }
 0x227   : > { %v1497_v12 = vpop.permute.xlu1 %1496 }
 0x228   : > { %v1583_v13 = vadd.f32 %v1497_v12, %v1420_v49 }
 0x22a   : > { %v1639_v27 = vcombine.low %v1575_v16, %v1583_v13 }
 0x22b   : > { %v1529_v22 = vpop.permute.xlu1 %1528 }
 0x22c   : > { %v1599_v28 = vadd.f32 %v1529_v22, %v1438_v3  ;;  %v1647_v43 = vrot.slane %v1639_v27, %v2400_v10  ;;  %v1489_v22 = vpop.permute.xlu0 %1488  ;;  %v1595_v27 = vadd.f32 %v1521_v1, %v2690_v40 }
 0x22e   : > { %v1640_v35 = vcombine.low %v1591_v25, %v1599_v28 }
 0x22f   : > { %v1533_v41 = vpop.permute.xlu1 %1532 }
 0x230   : > { %v1654_v11 = vrot.slane %v1640_v35, %v2400_v10  ;;  %v1601_v18 = vadd.f32 %v1533_v41, %v1440_v34  ;;  %v1592_v34 = vadd.f32 %v1515_v58, %v2679_v29  ;;  %v1587_v58 = vadd.f32 %v1505_v61, %v2801_v21 }
 0x231   : > { %v1578_v21 = vadd.f32 %v1487_v24, %v2730_v63  ;;  %v1580_v61 = vadd.f32 %v1491_v59, %v2751_v32 }
 0x232   : > { %v1655_v51 = vcombine.low %v1647_v43, %v1654_v11  ;;  %v1702_v49 = vcombine.low %v1593_v46, %v1601_v18  ;;  %v1594_v43 = vadd.f32 %v1519_v0, %v2701_v44  ;;  %v1588_v18 = vadd.f32 %v2825_v2, %v2667_v15 }
 0x233   : > { %v1499_v56 = vpop.permute.xlu1 %1498  ;;  %v1589_v15 = vadd.f32 %v2829_v37, %v2672_v20 }
 0x234   : > { %v1662_v39 = vrot.slane %v1655_v51, %v2400_v10  ;;  %v1584_v5 = vadd.f32 %v1499_v56, %v2742_v26  ;;  %v1716_v13 = vrot.slane %v1702_v49, %v2400_v10  ;;  %v1579_v26 = vadd.f32 %v1489_v22, %v2735_v8  ;;  %v1493_v51 = vpop.permute.xlu0 %1492 }
 0x235   : > { %v1794_v63 = vcombine.low %v1580_v61, %v1588_v18  ;;  %v1581_v32 = vadd.f32 %v1493_v51, %v2739_v19 }
 0x236   : > { %1663 = vrot.lane.b32.xlu0 %v1662_v39, %s2268_s5  ;;  %v1670_v36 = vcombine.low %v1576_v48, %v1584_v5  ;;  %v1763_v28 = vcombine.low %v1579_v26, %v1587_v58  ;;  %v1596_v39 = vadd.f32 %v2827_v6, %v2706_v47  ;;  %s2028_s5 = sshll.u32 %s1890_s30, 6 }
 0x237   : > { %v1501_v57 = vpop.permute.xlu1 %1500  ;;  %v1802_v6 = vrot.slane %v1794_v63, %v2400_v10  ;;  %v1825_v19 = vcombine.low %v1581_v32, %v1589_v15 }
 0x238   : > { %v1585_v3 = vadd.f32 %v1501_v57, %v2765_v31  ;;  %v1678_v31 = vrot.slane %v1670_v36, %v2400_v10  ;;  %v1771_v40 = vrot.slane %v1763_v28, %v2400_v10  ;;  %v1525_v2 = vpop.permute.xlu0 %1524 }
 0x239   : > { %v1597_v5 = vadd.f32 %v1525_v2, %v2718_v54  ;;  %v1833_v37 = vrot.slane %v1825_v19, %v2400_v10 }
 0x23a   : > { %v1701_v55 = vcombine.low %v1577_v62, %v1585_v3 }
 0x23b   : > { %v1531_v12 = vpop.permute.xlu1 %1530 }
 0x23c   : > { %v1709_v60 = vrot.slane %v1701_v55, %v2400_v10  ;;  %v1600_v16 = vadd.f32 %v1531_v12, %v2749_v30  ;;  %v1303_v36 = vpop.permute.xlu0 %1302 }
 0x23d   : > { %v1410_v58 = vadd.f32 %v1303_v36, %v2713_v52 }
 0x23e   : > { %v1671_v33 = vcombine.low %v1592_v34, %v1600_v16  ;;  %v1717_v14 = vcombine.low %v1709_v60, %v1716_v13 }
 0x23f   : > { %v1535_v25 = vpop.permute.xlu1 %1534 }
 0x240   : > { %v1685_v7 = vrot.slane %v1671_v33, %v2400_v10  ;;  %v1724_v29 = vrot.slane %v1717_v14, %v2400_v10  ;;  %v1602_v35 = vadd.f32 %v1535_v25, %v2758_v38  ;;  %v1339_v16 = vpop.permute.xlu0 %1338 }
 0x242   : > { %1725 = vrot.lane.b32.xlu0 %v1724_v29, %s2269_s6  ;;  %v1686_v42 = vcombine.low %v1678_v31, %v1685_v7  ;;  %v1733_v1 = vcombine.low %v1594_v43, %v1602_v35  ;;  %v1428_v31 = vadd.f32 %v1339_v16, %v2815_v9  ;;  %s267_s6 = scalar_lea.vmem [#allocation2], %s2003_s14 }
 0x243   : > { %v1537_v30 = vpop.permute.xlu1 %1536 }
 0x244   : > { %v1603_v41 = vadd.f32 %v1537_v30, %v2788_v4  ;;  %v1693_v8 = vrot.slane %v1686_v42, %v2400_v10  ;;  %v1747_v46 = vrot.slane %v1733_v1, %v2400_v10  ;;  %v1479_v33 = vpop.permute.xlu0 %1478 }
 0x245   : > { %v1574_v30 = vadd.f32 %v1479_v33, %v1410_v58 }
 0x246   : > { %v1764_v11 = vcombine.low %v1595_v27, %v1603_v41  ;;  %1694 = vrot.lane.b32.xlu1 %v1693_v8, %s2270_s8  ;;  %s1894_s8 = sshll.u32 %s267_s6, 4  ;;  %s2897_s8 = int_to_ptr.vmem [resolvable:$true] %s1894_s8 }
 0x247   : > { %v1503_v56 = vpop.permute.xlu1 %1502 }
 0x248   : > { %v1778_v38 = vrot.slane %v1764_v11, %v2400_v10  ;;  %v1586_v4 = vadd.f32 %v1503_v56, %v2772_v50  ;;  %v1511_v26 = vpop.permute.xlu0 %1510 }
 0x249   : > { %v1590_v42 = vadd.f32 %v1511_v26, %v1428_v31 }
 0x24a   : > { %v1732_v44 = vcombine.low %v1578_v21, %v1586_v4  ;;  %v1779_v0 = vcombine.low %v1771_v40, %v1778_v38 }
 0x24b   : > { %v1539_v24 = vpop.permute.xlu1 %1538 }
 0x24c   : > { %v1740_v59 = vrot.slane %v1732_v44, %v2400_v10  ;;  %v1604_v57 = vadd.f32 %v1539_v24, %v2794_v17  ;;  %v1786_v50 = vrot.slane %v1779_v0, %v2400_v10 }
 0x24e   : > { %v1795_v62 = vcombine.low %v1596_v39, %v1604_v57  ;;  %1787 = vrot.lane.b32.xlu0 %v1786_v50, %s2271_s9  ;;  %v1748_v47 = vcombine.low %v1740_v59, %v1747_v46 }
 0x24f   : > { %v1541_v49 = vpop.permute.xlu1 %1540 }
 0x250   : > { %v1809_v3 = vrot.slane %v1795_v62, %v2400_v10  ;;  %v1605_v17 = vadd.f32 %v1541_v49, %v2806_v45  ;;  %v1755_v48 = vrot.slane %v1748_v47, %v2400_v10 }
 0x252   : > { %v1826_v55 = vcombine.low %v1597_v5, %v1605_v17  ;;  %1756 = vrot.lane.b32.xlu1 %v1755_v48, %s2272_s10  ;;  %v1810_v20 = vcombine.low %v1802_v6, %v1809_v3  ;;  %s2895_s10 = scalar_lea.hbm %s2952_s4, %s2028_s5 }
 0x253   : > { %v1321_v45 = vpop.permute.xlu1 %1320 }
 0x254   : > { %v1840_v34 = vrot.slane %v1826_v55, %v2400_v10  ;;  %v1817_v12 = vrot.slane %v1810_v20, %v2400_v10  ;;  %v1419_v7 = vadd.f32 %v1321_v45, %v2605_v53 }
 0x256   : > { %1818 = vrot.lane.b32.xlu1 %v1817_v12, %s2273_s11  ;;  %v1841_v13 = vcombine.low %v1833_v37, %v1840_v34  ;;  %s2166_s11 = scalar_lea.vmem %s2897_s8, 64 }
 0x257   : > { %v1357_v60 = vpop.permute.xlu1 %1356  ;;  %p2167_p1 = scmp.ne.s32.totalorder %s2897_s8, %s2166_s11 }
 0x258   : > { %v1848_v54 = vrot.slane %v1841_v13, %v2400_v10  ;;  %v1437_v25 = vadd.f32 %v1357_v60, %v2781_v23 }
 0x259   : > { %p2168_p2 = pnand %p2167_p1, %p2352_p3 }
 0x25a   : > { %1849 = vrot.lane.b32.xlu0 %v1848_v54, %s2274_s12  ;;  %s2275_s12 = smov [#allocation2]  }
 0x25b   : > { %v1495_v22 = vpop.permute.xlu1 %1494  ;;  %p2169_p4 = pneg %p2168_p2  ;;  %s2170_s14 = sshll.u32 %s2275_s12, 4  ;;  %s2171_s14 = int_to_ptr.vmem [resolvable:$false] %s2170_s14 }
 0x25c   : > { %v1582_v27 = vadd.f32 %v1495_v22, %v1419_v7  ;;  %s2172_s23 = scalar_lea.vmem %s2171_s14, 128  ;;  %p2173_p5 = scmp.lt.s32.totalorder %s2897_s8, %s2171_s14 }
 0x25d   : > { %p2174_p6 = scmp.lt.s32.totalorder %s2172_s23, %s2166_s11 }
 0x25e   : > { %v1610_v35 = vcombine.low %v1574_v30, %v1582_v27 }
 0x25f   : > { %v1527_v14 = vpop.permute.xlu1 %1526  ;;  %p2175_p7 = por %p2174_p6, %p2173_p5 }
 0x260   : > { %v1598_v29 = vadd.f32 %v1527_v14, %v1437_v25  ;;  %v1618_v8 = vrot.slane %v1610_v35, %v2400_v10 }
 0x261   : > { %p2176_p9 = pnand %p2175_p7, %p2169_p4 }
 0x262   : > { %v1611_v28 = vcombine.low %v1590_v42, %v1598_v29 }
 0x264   : > { %v1625_v41 = vrot.slane %v1611_v28, %v2400_v10 }
 0x266   : > { %v1626_v43 = vcombine.low %v1618_v8, %v1625_v41 }
 0x268   : > { %v1633_v53 = vrot.slane %v1626_v43, %v2400_v10  ;;  %v2025_v10 = vld [vmem:[%s2951_s3] ss:$0 sm:$0xff] }
 0x2a8   : > { %v1664_v23 = vpop.permute.xlu0 %1663 }
 0x2a9   : > { %v1853_v11 = vsel %vm1852_vm2, %v1633_v53, %v1664_v23 }
 0x2b4   : > { %v1726_v52 = vpop.permute.xlu0 %1725 }
 0x2b8   : > { %v1695_v9 = vpop.permute.xlu1 %1694 }
 0x2b9   : > { %v1855_v21 = vsel %vm1854_vm3, %v1853_v11, %v1695_v9 }
 0x2ba   : > { %v1857_v51 = vsel %vm1856_vm4, %v1855_v21, %v1726_v52 }
 0x2c0   : > { %v1788_v56 = vpop.permute.xlu0 %1787 }
 0x2c4   : > { %v1757_v61 = vpop.permute.xlu1 %1756 }
 0x2c5   : > { %v1858_v40 = vsel %vm792_vm1, %v1857_v51, %v1757_v61 }
 0x2c6   : > { %v1860_v38 = vsel %vm1859_vm5, %v1858_v40, %v1788_v56 }
 0x2c8   : > { %v1819_v1 = vpop.permute.xlu1 %1818 }
 0x2c9   : > { %v1862_v4 = vsel %vm1861_vm6, %v1860_v38, %v1819_v1 }
 0x2cc   : > { %v1850_v18 = vpop.permute.xlu0 %1849 }
 0x2cd   : > { %v1864_v44 = vsel %vm1863_vm7, %v1862_v4, %v1850_v18 }
 0x2ce   : > { %v1872_v0 = vadd.f32 %v2025_v10, %v1864_v44 }
 0x2d0   : > { %vm1873_vm8 = vcmp.ge.f32.partialorder %v1872_v0, 0.0  ;;  %v1874_v39 = vmul.f32 0.01, %v1872_v0 }
 0x2d2   : > { %v1875_v63 = vsel %vm1873_vm8, %v1872_v0, %v1874_v39 }
 0x2d3   : > { %1877 = vst.msk [vmem:[%s267_s6] sm:$0xf] %vm1876_vm9, %v1875_v63 }
 0x2d4   : > { %2179 = shalt.err (!%p2176_p9)
}
 0x2d5   : > { %s2180_s13 = scalar_lea.hbm %s2895_s10, 64  ;;  %s2184_s30 = scalar_lea.hbm %s2952_s4, 256 }
 0x2d6   : > { %p2181_p10 = scmp.ne.s32.totalorder %s2895_s10, %s2180_s13  ;;  %p2185_p13 = scmp.lt.u32.totalorder %s2895_s10, %s2952_s4 }
 0x2d7   : > { %p2186_p0 = scmp.lt.u32.totalorder %s2184_s30, %s2180_s13  ;;  %p2188_p2 = scmp.lt.u32.totalorder %s2180_s13, %s2895_s10 }
 0x2d8   : > { %p2182_p11 = pnand %p2181_p10, %p2352_p3 }
 0x2d9   : > { %p2187_p1 = por %p2186_p0, %p2185_p13 }
 0x2da   : > { %p2183_p12 = pneg %p2182_p11 }
 0x2db   : > { %p2189_p4 = por %p2188_p2, %p2187_p1 }
 0x2dd   : > { %p2190_p5 = pnand %p2189_p4, %p2183_p12 }
 0x2df   : > { %2193 = shalt.err (!%p2190_p5)
}
 0x2e0   : > { %2078 = dma.vmem_to_hbm [thread:$0]  (%p2352_p3), %s2897_s8, 64, %s2895_s10, %s1879_s18  }
 0x2e1 PF: > { %p2084_p6 = scmp.ge.s32.totalorder %s2260_s22, 2  ;;  %s1906_s19 = sand.u32 1, %s2232_s15  }
 0x2e2   : > { %s1907_s9 = scalar_lea.sflag [#allocation3], %s1906_s19 }
 0x2e3   : > { %p2081_p7 = pnand %p2084_p6, %p2361_p8 }
 0x2e5   : > { %2227 = dma.done.wait (!%p2081_p7), %s1907_s9, 64  }
 0x2e6   : > { %2229 = vsyncadd (!%p2081_p7), %s1907_s9, 4294967232  ;;  %s17_s22 = sadd.s32 1, %s2260_s22   ;;  %s2956_s15 = smov %s2236_s16 }
 0x2e7   : > { %p14_p9 = scmp.ge.s32.totalorder %s17_s22, 6   ;;  %s2957_s16 = smov %s2240_s17 }
 0x2e8   : > { %s2958_s17 = smov %s2370_s7  ;;  %s2959_s18 = smov %s2252_s20 }
 0x2e9   : > { %s2960_s19 = smov %s2256_s21  ;;  %s2961_s20 = smov %s2964_s25 }
 0x2ea   : > { %s2962_s21 = smov %s2968_s26  ;;  %16 = sbr.rel (!%p14_p9) target bundleno = 5 (0x5), region = 74 }
 0x2f1   :  { %1912 = vsyncpa [#allocation3], 1 }
 0x2f2   :  { %1914 = vsyncpa [#allocation3 + $0x1], 1 }

</bundles_post_ra>
